<compile_context>
chip_gen: v6e
topology: v6e:2x2x1
jax: 0.10.0
libtpu: 0.0.40
codegen_flags: <defaults>
</compile_context>

<pallas_src>
import jax
import jax.numpy as jnp
from jax import lax
from jax.experimental import pallas as pl
from jax.experimental.pallas import tpu as pltpu


def _round_up(x, m):
    return (x + m - 1) // m * m


# -----------------------------------------------------------------------------
# Pass 1: conv-as-matmul (bf16 MXU, f32 accumulate) + per-tile BN partial stats
# -----------------------------------------------------------------------------
def _conv_stats_kernel(p_ref, w_ref, conv_ref, stats_ref):
    # p_ref:     (TM, Kp)     bf16   im2col patch tile
    # w_ref:     (Kp, OCp)    bf16   conv weight (K-major, OC padded to 128)
    # conv_ref:  (TM, OCp)    f32    conv output tile
    # stats_ref: (1, 2, OCp)  f32    per-tile [sum; sum of squares] over the M rows
    acc = jnp.dot(p_ref[...], w_ref[...], preferred_element_type=jnp.float32)
    conv_ref[...] = acc
    s1 = jnp.sum(acc, axis=0, keepdims=True)           # (1, OCp)
    s2 = jnp.sum(acc * acc, axis=0, keepdims=True)     # (1, OCp)
    stats_ref[0] = jnp.concatenate([s1, s2], axis=0)   # (2, OCp)


# -----------------------------------------------------------------------------
# Pass 2: folded BatchNorm (y = x * scale + bias) + ReLU
# -----------------------------------------------------------------------------
def _bn_relu_kernel(x_ref, scale_ref, bias_ref, o_ref):
    y = x_ref[...] * scale_ref[...] + bias_ref[...]
    o_ref[...] = jnp.maximum(y, 0.0).astype(o_ref.dtype)


# -----------------------------------------------------------------------------
# Wrapper: NCHW -> bf16 patches -> Pallas matmul+stats -> Pallas BN+ReLU -> NCHW
# -----------------------------------------------------------------------------
def basic_conv2d(x, weight, gamma, beta, *, kernel_size, padding, eps=1e-5,
                 tile_m=512):
    """Fused Conv2d(bias=False) -> BatchNorm2d(training batch stats) -> ReLU.

    x: (N, C, H, W) f32; weight: (OC, C, KH, KW) f32; gamma/beta: (OC,) f32.
    Returns (N, OC, OH, OW) f32 (PyTorch NCHW API parity).
    """
    n, c, h, w = x.shape
    oc = weight.shape[0]
    kh, kw = kernel_size
    ph, pw = padding
    oh = h + 2 * ph - kh + 1
    ow = w + 2 * pw - kw + 1
    m = n * oh * ow
    kdim = c * kh * kw

    ocp = _round_up(oc, 128)            # lane-dense output channels
    kp = _round_up(kdim, 128)           # aligned contraction dim
    tm = min(tile_m, _round_up(m, 128))
    mp = _round_up(m, tm)
    grid_m = mp // tm

    # HBM-side patch extraction in bf16 via XLA conv with an identity kernel.
    # Output channel ordering is (c, kh, kw)-major, matching weight.reshape(OC, -1).
    patches = lax.conv_general_dilated_patches(
        x.astype(jnp.bfloat16), filter_shape=(kh, kw), window_strides=(1, 1),
        padding=[(ph, ph), (pw, pw)],
        dimension_numbers=("NCHW", "OIHW", "NHWC"))            # (N, OH, OW, Kdim)
    patches = patches.reshape(m, kdim)
    # Zero padding is a no-op for both the matmul and the stats sums.
    patches = jnp.pad(patches, ((0, mp - m), (0, kp - kdim)))

    w2d = weight.reshape(oc, kdim).T.astype(jnp.bfloat16)      # (Kdim, OC)
    w2d = jnp.pad(w2d, ((0, kp - kdim), (0, ocp - oc)))        # (Kp, OCp)

    cost = pl.CostEstimate(
        flops=2 * mp * kp * ocp,
        transcendentals=0,
        bytes_accessed=mp * kp * 2 + kp * ocp * 2 + mp * ocp * 4 + grid_m * 2 * ocp * 4)

    conv_out, partial_stats = pl.pallas_call(
        _conv_stats_kernel,
        out_shape=(jax.ShapeDtypeStruct((mp, ocp), jnp.float32),
                   jax.ShapeDtypeStruct((grid_m, 2, ocp), jnp.float32)),
        grid_spec=pl.GridSpec(
            grid=(grid_m,),
            in_specs=[pl.BlockSpec((tm, kp), lambda i: (i, 0)),
                      pl.BlockSpec((kp, ocp), lambda i: (0, 0))],
            out_specs=(pl.BlockSpec((tm, ocp), lambda i: (i, 0)),
                       pl.BlockSpec((1, 2, ocp), lambda i: (i, 0, 0))),
        ),
        compiler_params=pltpu.CompilerParams(
            dimension_semantics=("parallel",)),
        cost_estimate=cost,
    )(patches, w2d)

    # Fold BN batch statistics into per-channel scale/bias (tiny O(OC) math, f32).
    # Padded M rows are all-zero patches -> contribute 0 to both sums; divide by true M.
    sums = jnp.sum(partial_stats, axis=0)                      # (2, OCp)
    mean = sums[0] / m
    var = jnp.maximum(sums[1] / m - mean * mean, 0.0)          # biased variance (PyTorch norm)
    inv_std = lax.rsqrt(var + eps)
    gamma_p = jnp.pad(gamma.astype(jnp.float32), (0, ocp - oc))
    beta_p = jnp.pad(beta.astype(jnp.float32), (0, ocp - oc))
    scale = (gamma_p * inv_std).reshape(1, ocp)
    bias = (beta_p - mean * gamma_p * inv_std).reshape(1, ocp)

    out2d = pl.pallas_call(
        _bn_relu_kernel,
        out_shape=jax.ShapeDtypeStruct((mp, ocp), jnp.float32),
        grid_spec=pl.GridSpec(
            grid=(grid_m,),
            in_specs=[pl.BlockSpec((tm, ocp), lambda i: (i, 0)),
                      pl.BlockSpec((1, ocp), lambda i: (0, 0)),
                      pl.BlockSpec((1, ocp), lambda i: (0, 0))],
            out_specs=pl.BlockSpec((tm, ocp), lambda i: (i, 0)),
        ),
        compiler_params=pltpu.CompilerParams(
            dimension_semantics=("parallel",)),
    )(conv_out, scale, bias)

    # TODO(synk): in a full network keep activations NHWC end-to-end and fold this final
    # NCHW transpose into the consumer; it exists only for PyTorch API parity.
    out = out2d[:m, :oc].reshape(n, oh, ow, oc)                # NHWC
    return jnp.transpose(out, (0, 3, 1, 2))                    # NCHW


# -----------------------------------------------------------------------------
# Pure-JAX f32 reference (same semantics) for a correctness gate
# -----------------------------------------------------------------------------
def basic_conv2d_ref(x, weight, gamma, beta, *, padding, eps=1e-5):
    y = lax.conv_general_dilated(
        x, weight, window_strides=(1, 1),
        padding=[(padding[0], padding[0]), (padding[1], padding[1])],
        dimension_numbers=("NCHW", "OIHW", "NCHW"))
    mean = jnp.mean(y, axis=(0, 2, 3), keepdims=True)
    var = jnp.mean((y - mean) ** 2, axis=(0, 2, 3), keepdims=True)
    yn = (y - mean) * lax.rsqrt(var + eps)
    yn = yn * gamma.reshape(1, -1, 1, 1) + beta.reshape(1, -1, 1, 1)
    return jnp.maximum(yn, 0.0)


if __name__ == "__main__":
    # BasicConv2d(in_channels=4, out_channels=8, kernel_size=3, padding=1)
    # applied to x of shape (2, 4, 16, 16).
    key = jax.random.PRNGKey(0)
    kx, kwt, kg, kb = jax.random.split(key, 4)

    N, C, H, W = 2, 4, 16, 16
    OC, KH, KW = 8, 3, 3
    PAD = (1, 1)

    x = jax.random.normal(kx, (N, C, H, W), dtype=jnp.float32)
    weight = jax.random.normal(kwt, (OC, C, KH, KW), dtype=jnp.float32) * 0.1
    gamma = 1.0 + 0.1 * jax.random.normal(kg, (OC,), dtype=jnp.float32)
    beta = 0.1 * jax.random.normal(kb, (OC,), dtype=jnp.float32)

    # tile_m=128 -> 4-step grid: exercises the double-buffered BlockSpec pipeline.
    out = basic_conv2d(x, weight, gamma, beta, kernel_size=(KH, KW),
                       padding=PAD, tile_m=128)
    out = jax.block_until_ready(out)

    ref = basic_conv2d_ref(x, weight, gamma, beta, padding=PAD)
    ref = jax.block_until_ready(ref)

    assert out.shape == (N, OC, H, W)
    # bf16 MXU inputs with f32 accumulation: compare against the f32 reference at a
    # bf16-level tolerance (post-BN outputs are O(1), so this remains a meaningful check).
    assert jnp.allclose(out, ref, atol=5e-2, rtol=5e-2), float(jnp.max(jnp.abs(out - ref)))

    print("KERNEL_OK")
</pallas_src>

<mosaic_0001>
module attributes {stable_mosaic.version = 11 : i64} {
  func.func @_conv_stats_kernel(%arg0: i32, %arg1: memref<128x128xbf16, #tpu.memory_space<vmem>>, %arg2: memref<128x128xbf16, #tpu.memory_space<vmem>>, %arg3: memref<128x128xf32, #tpu.memory_space<vmem>>, %arg4: memref<1x2x128xf32, #tpu.memory_space<vmem>>) attributes {dimension_semantics = [#tpu.dimension_semantics<parallel>], iteration_bounds = array<i64: 4>, scalar_prefetch = 0 : i64, scratch_operands = 0 : i64, tpu.core_type = #tpu.core_type<tc>, window_params = [{transform_indices = @transform_0, window_bounds = array<i64: 128, 128>}, {pipeline_mode = #tpu.pipeline_mode<synchronous>, transform_indices = @transform_1, window_bounds = array<i64: 128, 128>}, {transform_indices = @transform_2, window_bounds = array<i64: 128, 128>}, {transform_indices = @transform_3, window_bounds = array<i64: 1, 2, 128>}]} {
    %c0 = arith.constant 0 : index
    %c0_0 = arith.constant 0 : index
    %0 = vector.load %arg1[%c0, %c0_0] : memref<128x128xbf16, #tpu.memory_space<vmem>>, vector<128x128xbf16>
    %c0_1 = arith.constant 0 : index
    %c0_2 = arith.constant 0 : index
    %1 = vector.load %arg2[%c0_1, %c0_2] : memref<128x128xbf16, #tpu.memory_space<vmem>>, vector<128x128xbf16>
    %cst = arith.constant dense<0.000000e+00> : vector<128x128xf32>
    %2 = tpu.matmul %0, %1, %cst {dimension_numbers = #tpu.dot_dimension_numbers<[1], [0], [0], [1], [0, 0, 1, 1], [], []>} : vector<128x128xbf16>, vector<128x128xbf16>, vector<128x128xf32> -> vector<128x128xf32>
    %c0_3 = arith.constant 0 : index
    %c0_4 = arith.constant 0 : index
    %3 = vector.load %arg3[%c0_3, %c0_4] : memref<128x128xf32, #tpu.memory_space<vmem>>, vector<128x128xf32>
    tpu.vector_store %arg3[%c0_3, %c0_4], %2 {strides = array<i32>} : memref<128x128xf32, #tpu.memory_space<vmem>>, vector<128x128xf32>,
    %cst_5 = arith.constant dense<0.000000e+00> : vector<128xf32>
    %4 = vector.multi_reduction <add>, %2, %cst_5 [0] : vector<128x128xf32> to vector<128xf32>
    %5 = vector.shape_cast %4 : vector<128xf32> to vector<1x128xf32>
    %6 = arith.mulf %2, %2 : vector<128x128xf32>
    %cst_6 = arith.constant dense<0.000000e+00> : vector<128xf32>
    %7 = vector.multi_reduction <add>, %6, %cst_6 [0] : vector<128x128xf32> to vector<128xf32>
    %8 = vector.shape_cast %7 : vector<128xf32> to vector<1x128xf32>
    %9 = tpu.concatenate %5, %8 in 0 : vector<1x128xf32>, vector<1x128xf32> -> vector<2x128xf32>
    %c0_7 = arith.constant 0 : index
    %c0_8 = arith.constant 0 : index
    %c0_9 = arith.constant 0 : index
    %10 = vector.load %arg4[%c0_7, %c0_8, %c0_9] : memref<1x2x128xf32, #tpu.memory_space<vmem>>, vector<1x2x128xf32>
    %11 = vector.shape_cast %10 : vector<1x2x128xf32> to vector<2x128xf32>
    %12 = vector.shape_cast %9 : vector<2x128xf32> to vector<1x2x128xf32>
    tpu.vector_store %arg4[%c0_7, %c0_8, %c0_9], %12 {strides = array<i32>} : memref<1x2x128xf32, #tpu.memory_space<vmem>>, vector<1x2x128xf32>,
    return
  }
  func.func @transform_0(%arg0: i32) -> (i32, i32) {
    %c0_i32 = arith.constant 0 : i32
    %c0_i32_0 = arith.constant 0 : i32
    return %arg0, %c0_i32 : i32, i32
  }
  func.func @transform_1(%arg0: i32) -> (i32, i32) {
    %c0_i32 = arith.constant 0 : i32
    %c0_i32_0 = arith.constant 0 : i32
    %c0_i32_1 = arith.constant 0 : i32
    return %c0_i32, %c0_i32_0 : i32, i32
  }
  func.func @transform_2(%arg0: i32) -> (i32, i32) {
    %c0_i32 = arith.constant 0 : i32
    %c0_i32_0 = arith.constant 0 : i32
    return %arg0, %c0_i32 : i32, i32
  }
  func.func @transform_3(%arg0: i32) -> (i32, i32, i32) {
    %c0_i32 = arith.constant 0 : i32
    %c0_i32_0 = arith.constant 0 : i32
    %c0_i32_1 = arith.constant 0 : i32
    return %arg0, %c0_i32, %c0_i32_0 : i32, i32, i32
  }
}

</mosaic_0001>

<bundles_post_ra>
// kernel: tpu_custom_call.1
= control target key start
LH: loop header
LB: loop body
LE: loop exit
PB: predicated region body
PF: predicated region fallthrough
CT: control target
= control target key end

     0   :  { %9 = vsyncpa [#allocation3], 0  ;;  %s1309_s0 = inlined_call_operand.hbm [shape: bf16[512,128], index: 0, kind: input, shape index: {}]   ;;  %s1310_s1 = inlined_call_operand.hbm [shape: bf16[128,128], index: 1, kind: input, shape index: {}]   ;;  %s1311_s2 = inlined_call_operand.hbm [shape: f32[512,128], index: 2, kind: output, shape index: {0}]   ;;  %s1312_s3 = inlined_call_operand.hbm [shape: f32[4,2,128], index: 3, kind: output, shape index: {1}]  }
   0x1   :  { %11 = vsyncpa [#allocation3 + $0x1], 0 }
   0x2   :  { %12 = vsyncpa [#allocation6], 0 }
   0x3   :  { %13 = vsyncpa [#allocation4], 0 }
   0x4   :  { %15 = vsyncpa [#allocation4 + $0x1], 0 }
   0x5   :  { %16 = vsyncpa [#allocation9], 0 }
   0x6   :  { %18 = vsyncpa [#allocation9 + $0x1], 0  ;;  %s1032_s12 = smov 0   ;;  %s1034_s13 = smov 0  }
   0x7   :  { %s1036_s14 = smov 0   ;;  %s1038_s15 = smov 0  }
   0x8 LB: > { %s1053_s16 = sadd.s32 4294967295, %s1002_s15   ;;  %s667_s17 = sadd.s32 4294967294, %s1002_s15   ;;  %s1002_s15 = sphi %s1038_s15, %s1333_s15   ;;  %s998_s14 = sphi %s1036_s14, %s1332_s14   ;;  %s994_s13 = sphi %s1034_s13, %s1331_s13   ;;  %s990_s12 = sphi %s1032_s12, %s1330_s12  }
   0x9   : > { %p44_p0 = scmp.ne.s32.totalorder %s994_s13, %s990_s12  ;;  %p1313_p1 = scmp.eq.s32.totalorder %s1053_s16, 0 }
   0xa   : > { %p95_p3 = scmp.eq.s32.totalorder %s667_s17, 3  ;;  %p668_p5 = scmp.ge.s32.totalorder %s1002_s15, 1 }
   0xb   : > { %p1062_p4 = por %p1313_p1, %p44_p0  ;;  %p128_p7 = scmp.lt.s32.totalorder %s1002_s15, 5 }
   0xc   : > { %p1067_p6 = por %p95_p3, %p44_p0  ;;  %s1004_s21 = smov [#allocation5]  }
   0xd   : > { %s1317_s18 = scalar_select %p1062_p4, 1, 0 }
   0xe   : > { %s1318_s19 = scalar_select %p1067_p6, 1, 0 }
   0xf   : > { %p1072_p8 = pnand %p668_p5, %p128_p7  ;;  %s140_s22 = sshll.u32 %s1004_s21, 4  ;;  %s141_s22 = int_to_ptr.vmem [resolvable:$true] %s140_s22 }
  0x10   : > { %s1085_s24 = sadd.s32 1, %s1002_s15   ;;  %s31_s25 = sadd.s32 1, %s998_s14 }
  0x11   : > { %s1319_s20 = scalar_select %p1072_p8, 1, 0 }
  0x12   : > { %p778_p9 = pneg %p1072_p8  ;;  %s28_s26 = ssub.s32 %s1002_s15, %s1085_s24 }
  0x13   : > { %s861_s27 = scalar_lea.vmem %s141_s22, 1024  ;;  %p869_p3 = scmp.lt.s32.totalorder %s141_s22, %s141_s22 }
  0x14   : > { %p1080_p10 = pnand %p778_p9, %p1313_p1  ;;  %p862_p12 = scmp.ne.s32.totalorder %s141_s22, %s861_s27 }
  0x15   : > { %p870_p5 = scmp.lt.s32.totalorder %s861_s27, %s861_s27 }
  0x16   : > { %p852_p11 = pneg %p1080_p10 }
  0x17   : > { %p871_p7 = por %p870_p5, %p869_p3 }
  0x18   : > { %p864_p13 = pnand %p862_p12, %p852_p11 }
  0x1a   : > { %p865_p0 = pneg %p864_p13 }
  0x1c   : > { %p872_p2 = pnand %p871_p7, %p865_p0 }
  0x1e   : > { %875 = shalt.err (!%p872_p2)
}
  0x1f   : > { %s1005_s28 = smov 64   ;;  %s1006_s29 = smov 4  }
  0x20   : > { %781 = dma.hbm_to_vmem [thread:$0]  (!%p1080_p10), %s1310_s1, 1024, %s141_s22, [#allocation6], %s1005_s28, %s1005_s28, %s1006_s29  }
  0x21   : > { %p29_p2 = scmp.eq.s32.totalorder %s28_s26, 0  ;;  %p38_p9 = scmp.ne.s32.totalorder %s998_s14, %s994_s13 }
  0x22   : > { %p39_p11 = scmp.eq.s32.totalorder %s1002_s15, 0  ;;  %p794_p12 = scmp.lt.s32.totalorder %s1002_s15, 4 }
  0x23   : > { %s1105_s5 = scalar_select %p29_p2, %s998_s14, %s31_s25  }
  0x24   : > { %p40_p13 = por %p39_p11, %p38_p9  ;;  %p1321_p0 = scmp.eq.s32.totalorder %s1053_s16, 3 }
  0x25   : > { %s154_s7 = sand.u32 1, %s998_s14   ;;  %s702_s8 = sshll.u32 %s1002_s15, 10 }
  0x26   : > { %p1109_p3 = por %p1321_p0, %p38_p9  ;;  %s671_s9 = sshll.u32 %s154_s7, 6 }
  0x27   : > { %s1118_s17 = scalar_lea.hbm %s1309_s0, %s702_s8  ;;  %s158_s21 = scalar_lea.vmem [#allocation2], %s671_s9 }
  0x28   : > { %s1322_s6 = scalar_select %p1109_p3, 1, 0 }
  0x29   : > { %s165_s22 = sshll.u32 %s158_s21, 4  ;;  %p1120_p10 = pnand %p794_p12, %p40_p13  ;;  %s1124_s22 = int_to_ptr.vmem [resolvable:$true] %s165_s22 }
  0x2a   : > { %s1126_s25 = scalar_lea.sflag [#allocation3], %s154_s7  ;;  %s876_s26 = scalar_lea.hbm %s1118_s17, 1024 }
  0x2b   : > { %p877_p5 = scmp.ne.s32.totalorder %s1118_s17, %s876_s26  ;;  %p878_p7 = pneg %p1120_p10 }
  0x2c   : > { %s881_s4 = scalar_lea.hbm %s1309_s0, 4096  ;;  %p882_p11 = scmp.lt.s32.totalorder %s1118_s17, %s1309_s0 }
  0x2d   : > { %p879_p2 = pnand %p878_p7, %p877_p5  ;;  %p883_p12 = scmp.lt.s32.totalorder %s881_s4, %s876_s26 }
  0x2f   : > { %p880_p9 = pneg %p879_p2  ;;  %p884_p13 = por %p883_p12, %p882_p11 }
  0x31   : > { %p885_p0 = pnand %p884_p13, %p880_p9 }
  0x33   : > { %888 = shalt.err (!%p885_p0)
}
  0x34   : > { %s889_s7 = scalar_lea.vmem %s1124_s22, 1024  ;;  %s1007_s10 = smov [#allocation2]  }
  0x35   : > { %p890_p1 = scmp.ne.s32.totalorder %s1124_s22, %s889_s7  ;;  %s894_s11 = sshll.u32 %s1007_s10, 4  ;;  %s895_s11 = int_to_ptr.vmem [resolvable:$false] %s894_s11 }
  0x36   : > { %s896_s21 = scalar_lea.vmem %s895_s11, 2048  ;;  %p897_p2 = scmp.lt.s32.totalorder %s1124_s22, %s895_s11 }
  0x37   : > { %p892_p6 = pnand %p890_p1, %p878_p7  ;;  %p898_p3 = scmp.lt.s32.totalorder %s896_s21, %s889_s7 }
  0x39   : > { %p893_p5 = pneg %p892_p6  ;;  %p899_p4 = por %p898_p3, %p897_p2 }
  0x3b   : > { %p900_p8 = pnand %p899_p4, %p893_p5 }
  0x3d   : > { %903 = shalt.err (!%p900_p8)
}
  0x3e   : > { %785 = dma.hbm_to_vmem [thread:$0]  (!%p1120_p10), %s1118_s17, 1024, %s1124_s22, %s1126_s25, %s1005_s28, %s1005_s28, %s1006_s29  }
  0x3f   : > { %p1324_p1 = scmp.ne.s32.totalorder %s1319_s20, 0 }
  0x40   : > { %s1153_s26 = sand.u32 (!%p1324_p1), 1, %s994_s13   ;;  %p1325_p4 = scmp.ne.s32.totalorder (!%p1324_p1), %s1317_s18, 0 }
  0x41   : > { %177 = sbr.rel (%p1324_p1) target bundleno = 374 (0x176), region = 28  ;;  %s675_s27 = sshll.u32 (!%p1324_p1), %s1153_s26, 6 }
  0x42   : > { %s180_s30 = scalar_lea.sflag (!%p1324_p1), [#allocation3], %s1153_s26  ;;  %s1157_s4 = scalar_lea.vmem (!%p1324_p1), [#allocation2], %s675_s27 }
  0x46   : > { %973 = dma.done.wait (%p1325_p4), %s180_s30, 1024  }
  0x47   : > { %975 = vsyncadd (%p1325_p4), %s180_s30, 4294966272  ;;  %p1326_p6 = scmp.eq.s32.totalorder %s1053_s16, 0 }
  0x49   : > { %977 = dma.done.wait (%p1326_p6), [#allocation6], 1024   ;;  %p1327_p8 = pmov %p1326_p6 }
  0x4a   : > { %v834_v0 = vld [vmem:[#allocation5 + $0x38] sm:$0xff]   ;;  %v835_v1 = vld [vmem:[#allocation5 + $0x30] sm:$0xff]   ;;  %v836_v2 = vld [vmem:[#allocation5 + $0x28] sm:$0xff]   ;;  %s677_s18 = sshll.u32 %s1153_s26, 7  ;;  %s703_s28 = sshll.u32 %s1053_s16, 11 }
  0x4b   : > { %979 = vsyncadd (%p1327_p8), [#allocation6], 4294966272  ;;  %720 = vmatprep.subr.bf16.mxu0 %v834_v0  ;;  %752 = vmatprep.subr.bf16.mxu1 %v834_v0  ;;  %v837_v3 = vld [vmem:[#allocation5 + $0x20] sm:$0xff]   ;;  %v838_v5 = vld [vmem:[#allocation5 + $0x18] sm:$0xff]   ;;  %s1178_s20 = scalar_lea.vmem [#allocation7], %s677_s18  ;;  %s1215_s23 = scalar_lea.hbm %s1311_s2, %s703_s28 }
  0x4c   : > { %721 = vmatpush3.bf16.msra.mxu0 %v834_v0  ;;  %760 = vmatpush3.bf16.msra.mxu1 %v834_v0  ;;  %v842_v4 = vld [vmem:[%s1157_s4] sm:$0xff]   ;;  %v839_v7 = vld [vmem:[#allocation5 + $0x10] sm:$0xff]   ;;  %v840_v8 = vld [vmem:[#allocation5 + $0x8] sm:$0xff]   ;;  %s539_s29 = sshll.u32 %s1178_s20, 4  ;;  %s521_s25 = scalar_lea.sflag [#allocation4], %s1153_s26  ;;  %s1217_s29 = int_to_ptr.vmem [resolvable:$true] %s539_s29 }
  0x4d   : > { %722 = vmatprep.subr.bf16.mxu0 %v835_v1  ;;  %753 = vmatprep.subr.bf16.mxu1 %v835_v1  ;;  %v846_v6 = vld [vmem:[%s1157_s4 + $0x20] sm:$0xff]   ;;  %v843_v10 = vld [vmem:[%s1157_s4 + $0x8] sm:$0xff]   ;;  %v844_v12 = vld [vmem:[%s1157_s4 + $0x10] sm:$0xff]   ;;  %s904_s8 = scalar_lea.vmem %s1217_s29, 2048  ;;  %p1328_p10 = scmp.ne.s32.totalorder %s1322_s6, 0 }
  0x4e   : > { %736 = vmatprep.mubr.bf16.mxu0 %v842_v4  ;;  %744 = vmatprep.mubr.bf16.mxu1 %v846_v6  ;;  %v841_v9 = vld [vmem:[#allocation5] sm:$0xff]   ;;  %v847_v11 = vld [vmem:[%s1157_s4 + $0x28] sm:$0xff]   ;;  %v848_v13 = vld [vmem:[%s1157_s4 + $0x30] sm:$0xff]   ;;  %p905_p3 = scmp.ne.s32.totalorder %s1217_s29, %s904_s8  ;;  %s1008_s9 = smov [#allocation7]  }
  0x4f   : > { %v845_v14 = vld [vmem:[%s1157_s4 + $0x18] sm:$0xff]   ;;  %s908_s7 = sshll.u32 %s1008_s9, 4  ;;  %s909_s7 = int_to_ptr.vmem [resolvable:$false] %s908_s7 }
  0x50   : > { %723 = vmatpush3.bf16.msra.mxu0 %v835_v1  ;;  %761 = vmatpush3.bf16.msra.mxu1 %v835_v1  ;;  %v849_v15 = vld [vmem:[%s1157_s4 + $0x38] sm:$0xff]   ;;  %p906_p7 = pnand %p905_p3, %p1328_p10  ;;  %s910_s10 = scalar_lea.vmem %s909_s7, 4096 }
  0x51   : > { %724 = vmatprep.subr.bf16.mxu0 %v836_v2  ;;  %754 = vmatprep.subr.bf16.mxu1 %v836_v2  ;;  %p911_p11 = scmp.lt.s32.totalorder %s1217_s29, %s909_s7  ;;  %p912_p12 = scmp.lt.s32.totalorder %s910_s10, %s904_s8 }
  0x52   : > { %p907_p9 = pneg %p906_p7 }
  0x53   : > { %p913_p13 = por %p912_p12, %p911_p11 }
  0x54   : > { %725 = vmatpush3.bf16.msra.mxu0 %v836_v2  ;;  %762 = vmatpush3.bf16.msra.mxu1 %v836_v2 }
  0x55   : > { %726 = vmatprep.subr.bf16.mxu0 %v837_v3  ;;  %755 = vmatprep.subr.bf16.mxu1 %v837_v3  ;;  %p914_p0 = pnand %p913_p13, %p907_p9 }
  0x58   : > { %727 = vmatpush3.bf16.msra.mxu0 %v837_v3  ;;  %763 = vmatpush3.bf16.msra.mxu1 %v837_v3 }
  0x59   : > { %728 = vmatprep.subr.bf16.mxu0 %v838_v5  ;;  %756 = vmatprep.subr.bf16.mxu1 %v838_v5 }
  0x5c   : > { %729 = vmatpush3.bf16.msra.mxu0 %v838_v5  ;;  %764 = vmatpush3.bf16.msra.mxu1 %v838_v5 }
  0x5d   : > { %730 = vmatprep.subr.bf16.mxu0 %v839_v7  ;;  %757 = vmatprep.subr.bf16.mxu1 %v839_v7 }
  0x60   : > { %731 = vmatpush3.bf16.msra.mxu0 %v839_v7  ;;  %765 = vmatpush3.bf16.msra.mxu1 %v839_v7 }
  0x61   : > { %732 = vmatprep.subr.bf16.mxu0 %v840_v8  ;;  %758 = vmatprep.subr.bf16.mxu1 %v840_v8 }
  0x64   : > { %733 = vmatpush3.bf16.msra.mxu0 %v840_v8  ;;  %766 = vmatpush3.bf16.msra.mxu1 %v840_v8 }
  0x65   : > { %734 = vmatprep.subr.bf16.mxu0 %v841_v9  ;;  %759 = vmatprep.subr.bf16.mxu1 %v841_v9 }
  0x68   : > { %735 = vmatpush3.bf16.msra.mxu0 %v841_v9  ;;  %767 = vmatpush3.bf16.msra.mxu1 %v841_v9 }
  0x6b   : > { %737 = vmatmul.mubr.bf16.vlgmr.msra.gmra.mxu0 %v843_v10  ;;  %745 = vmatmul.mubr.bf16.vlgmr.msra.gmra.mxu1 %v847_v11 }
  0x6c   : > { %740 = vmatprep.mubr.bf16.mxu0 %v844_v12  ;;  %748 = vmatprep.mubr.bf16.mxu1 %v848_v13 }
  0x73   : > { %741 = vmatmul.mubr.bf16.gmra.mxu0 %v845_v14  ;;  %749 = vmatmul.mubr.bf16.gmra.mxu1 %v849_v15 }
 0x12b   : > { %v738_v16 = vpop.f32.mrf.mxu0  ;;  %v1176_v17 = vpop.f32.mrf.mxu1 }
 0x12c   : > { %445 = vst [vmem:[%s1178_s20 + $0x10] sm:$0xff] %v738_v16  ;;  %453 = vst [vmem:[%s1178_s20 + $0x50] sm:$0xff] %v1176_v17  ;;  %v482_v29 = vmul.f32 %v738_v16, %v738_v16 }
 0x12d   : > { %v380_v18 = vpop.f32.mrf.mxu0  ;;  %v1183_v19 = vpop.f32.mrf.mxu1 }
 0x12e   : > { %443 = vst [vmem:[%s1178_s20] sm:$0xff] %v380_v18  ;;  %451 = vst [vmem:[%s1178_s20 + $0x40] sm:$0xff] %v1183_v19  ;;  %v480_v24 = vmul.f32 %v380_v18, %v380_v18 }
 0x12f   : > { %v739_v20 = vpop.f32.mrf.mxu0  ;;  %v1188_v21 = vpop.f32.mrf.mxu1 }
 0x130   : > { %446 = vst [vmem:[%s1178_s20 + $0x18] sm:$0xff] %v739_v20  ;;  %454 = vst [vmem:[%s1178_s20 + $0x58] sm:$0xff] %v1188_v21  ;;  %v483_v34 = vmul.f32 %v739_v20, %v739_v20 }
 0x131   : > { %v383_v22 = vpop.f32.mrf.mxu0  ;;  %v1193_v23 = vpop.f32.mrf.mxu1 }
 0x132   : > { %444 = vst [vmem:[%s1178_s20 + $0x8] sm:$0xff] %v383_v22  ;;  %v459_v25 = vadd.f32 %v383_v22, %v380_v18  ;;  %v481_v26 = vmul.f32 %v383_v22, %v383_v22  ;;  %452 = vst [vmem:[%s1178_s20 + $0x48] sm:$0xff] %v1193_v23 }
 0x133   : > { %v742_v27 = vpop.f32.mrf.mxu0  ;;  %v1198_v28 = vpop.f32.mrf.mxu1 }
 0x134   : > { %v460_v30 = vadd.f32 %v738_v16, %v459_v25  ;;  %v496_v31 = vadd.f32 %v481_v26, %v480_v24  ;;  %449 = vst [vmem:[%s1178_s20 + $0x30] sm:$0xff] %v742_v27  ;;  %457 = vst [vmem:[%s1178_s20 + $0x70] sm:$0xff] %v1198_v28 }
 0x135   : > { %v396_v32 = vpop.f32.mrf.mxu0  ;;  %v1205_v33 = vpop.f32.mrf.mxu1 }
 0x136   : > { %v497_v35 = vadd.f32 %v496_v31, %v482_v29  ;;  %447 = vst [vmem:[%s1178_s20 + $0x20] sm:$0xff] %v396_v32  ;;  %v461_v36 = vadd.f32 %v739_v20, %v460_v30  ;;  %455 = vst [vmem:[%s1178_s20 + $0x60] sm:$0xff] %v1205_v33  ;;  %v484_v40 = vmul.f32 %v396_v32, %v396_v32 }
 0x137   : > { %v743_v37 = vpop.f32.mrf.mxu0  ;;  %v1210_v38 = vpop.f32.mrf.mxu1 }
 0x138   : > { %v462_v39 = vadd.f32 %v461_v36, %v396_v32  ;;  %v498_v41 = vadd.f32 %v497_v35, %v483_v34  ;;  %450 = vst [vmem:[%s1178_s20 + $0x38] sm:$0xff] %v743_v37  ;;  %458 = vst [vmem:[%s1178_s20 + $0x78] sm:$0xff] %v1210_v38 }
 0x139   : > { %v399_v42 = vpop.f32.mrf.mxu0  ;;  %v431_v43 = vpop.f32.mrf.mxu1 }
 0x13a   : > { %v499_v44 = vadd.f32 %v498_v41, %v484_v40  ;;  %448 = vst [vmem:[%s1178_s20 + $0x28] sm:$0xff] %v399_v42  ;;  %v463_v45 = vadd.f32 %v462_v39, %v399_v42  ;;  %v485_v46 = vmul.f32 %v399_v42, %v399_v42  ;;  %456 = vst [vmem:[%s1178_s20 + $0x68] sm:$0xff] %v431_v43 }
 0x13b   : > { %917 = shalt.err (!%p914_p0)
}
 0x13c   : > { %s918_s11 = scalar_lea.hbm %s1215_s23, 2048  ;;  %s922_s30 = scalar_lea.hbm %s1311_s2, 8192 }
 0x13d   : > { %p919_p5 = scmp.ne.s32.totalorder %s1215_s23, %s918_s11  ;;  %p923_p4 = scmp.lt.s32.totalorder %s1215_s23, %s1311_s2 }
 0x13e   : > { %p924_p6 = scmp.lt.s32.totalorder %s922_s30, %s918_s11 }
 0x13f   : > { %p920_p2 = pnand %p919_p5, %p1328_p10 }
 0x140   : > { %p925_p8 = por %p924_p6, %p923_p4 }
 0x141   : > { %p921_p1 = pneg %p920_p2 }
 0x143   : > { %p926_p3 = pnand %p925_p8, %p921_p1 }
 0x145   : > { %929 = shalt.err (!%p926_p3)
}
 0x146   : > { %s1009_s20 = smov 128   ;;  %s1010_s28 = smov 8   ;;  %v486_v47 = vmul.f32 %v742_v27, %v742_v27  ;;  %v464_v48 = vadd.f32 %v742_v27, %v463_v45  ;;  %v500_v49 = vadd.f32 %v499_v44, %v485_v46  ;;  %v487_v50 = vmul.f32 %v743_v37, %v743_v37 }
 0x147   : > { %774 = dma.vmem_to_hbm [thread:$0]  (%p1328_p10), %s1217_s29, 2048, %s1215_s23, %s521_s25, %s1009_s20, %s1009_s20, %s1010_s28   ;;  %v488_v53 = vmul.f32 %v1183_v19, %v1183_v19  ;;  %v489_v57 = vmul.f32 %v1193_v23, %v1193_v23  ;;  %v490_v59 = vmul.f32 %v1176_v17, %v1176_v17  ;;  %v491_v62 = vmul.f32 %v1188_v21, %v1188_v21 }
 0x148   : > { %v465_v51 = vadd.f32 %v743_v37, %v464_v48  ;;  %v501_v52 = vadd.f32 %v500_v49, %v486_v47  ;;  %v492_v2 = vmul.f32 %v1205_v33, %v1205_v33  ;;  %v493_v6 = vmul.f32 %v431_v43, %v431_v43  ;;  %s678_s29 = sshll.u32 %s1153_s26, 1  ;;  %s699_s17 = sshll.u32 %s1053_s16, 5 }
 0x149   : > { %v494_v7 = vmul.f32 %v1198_v28, %v1198_v28  ;;  %v495_v10 = vmul.f32 %v1210_v38, %v1210_v38  ;;  %s214_s22 = scalar_lea.vmem [#allocation8], %s678_s29  ;;  %vm517_vm0 = vcmask 1040384   ;;  %s1273_s9 = scalar_lea.hbm %s1312_s3, %s699_s17 }
 0x14a   : > { %v502_v54 = vadd.f32 %v501_v52, %v487_v50  ;;  %v466_v55 = vadd.f32 %v465_v51, %v1183_v19  ;;  %s555_s23 = sshll.u32 %s214_s22, 4  ;;  %s526_s7 = scalar_lea.sflag [#allocation9], %s1153_s26  ;;  %s556_s23 = int_to_ptr.vmem [resolvable:$true] %s555_s23 }
 0x14b   : > { %s930_s10 = scalar_lea.vmem %s556_s23, 32  ;;  %s1011_s16 = smov [#allocation8]  }
 0x14c   : > { %v467_v56 = vadd.f32 %v466_v55, %v1193_v23  ;;  %v503_v58 = vadd.f32 %v502_v54, %v488_v53  ;;  %p931_p7 = scmp.ne.s32.totalorder %s556_s23, %s930_s10  ;;  %s934_s11 = sshll.u32 %s1011_s16, 4  ;;  %s935_s11 = int_to_ptr.vmem [resolvable:$false] %s934_s11 }
 0x14d   : > { %s936_s21 = scalar_lea.vmem %s935_s11, 64  ;;  %p937_p12 = scmp.lt.s32.totalorder %s556_s23, %s935_s11 }
 0x14e   : > { %v468_v60 = vadd.f32 %v1176_v17, %v467_v56  ;;  %v504_v61 = vadd.f32 %v503_v58, %v489_v57  ;;  %p932_p9 = pnand %p931_p7, %p1328_p10  ;;  %p938_p13 = scmp.lt.s32.totalorder %s936_s21, %s930_s10 }
 0x150   : > { %v505_v63 = vadd.f32 %v504_v61, %v490_v59  ;;  %v469_v0 = vadd.f32 %v1188_v21, %v468_v60  ;;  %p933_p11 = pneg %p932_p9  ;;  %p939_p0 = por %p938_p13, %p937_p12 }
 0x152   : > { %v470_v1 = vadd.f32 %v469_v0, %v1205_v33  ;;  %v506_v3 = vadd.f32 %v505_v63, %v491_v62  ;;  %p940_p5 = pnand %p939_p0, %p933_p11 }
 0x154   : > { %v507_v4 = vadd.f32 %v506_v3, %v492_v2  ;;  %v471_v5 = vadd.f32 %v470_v1, %v431_v43 }
 0x156   : > { %v472_v8 = vadd.f32 %v1198_v28, %v471_v5  ;;  %v508_v9 = vadd.f32 %v507_v4, %v493_v6 }
 0x158   : > { %v473_v11 = vadd.f32 %v1210_v38, %v472_v8  ;;  %v509_v12 = vadd.f32 %v508_v9, %v494_v7 }
 0x15a   : > { %v474_v13 = vrot.slane %v473_v11, 4  ;;  %v510_v14 = vadd.f32 %v509_v12, %v495_v10 }
 0x15c   : > { %v475_v15 = vadd.f32 %v474_v13, %v473_v11  ;;  %v511_v16 = vrot.slane %v510_v14, 4 }
 0x15e   : > { %v476_v17 = vrot.slane %v475_v15, 2  ;;  %v512_v18 = vadd.f32 %v511_v16, %v510_v14 }
 0x160   : > { %v477_v19 = vadd.f32 %v476_v17, %v475_v15  ;;  %v513_v20 = vrot.slane %v512_v18, 2 }
 0x162   : > { %v478_v21 = vrot.slane %v477_v19, 1  ;;  %v514_v22 = vadd.f32 %v513_v20, %v512_v18 }
 0x164   : > { %v515_v23 = vrot.slane %v514_v22, 1  ;;  %v479_v24 = vadd.f32 %v478_v21, %v477_v19 }
 0x166   : > { %v516_v25 = vadd.f32 %v515_v23, %v514_v22 }
 0x168   : > { %v518_v26 = vsel %vm517_vm0, %v479_v24, %v516_v25 }
 0x169   : > { %519 = vst [vmem:[%s214_s22] sm:$0x3] %v518_v26 }
 0x16a   : > { %943 = shalt.err (!%p940_p5)
}
 0x16b   : > { %s944_s27 = scalar_lea.hbm %s1273_s9, 32  ;;  %s948_s4 = scalar_lea.hbm %s1312_s3, 128 }
 0x16c   : > { %p945_p2 = scmp.ne.s32.totalorder %s1273_s9, %s944_s27  ;;  %p949_p6 = scmp.lt.s32.totalorder %s1273_s9, %s1312_s3 }
 0x16d   : > { %p950_p8 = scmp.lt.s32.totalorder %s948_s4, %s944_s27 }
 0x16e   : > { %p946_p1 = pnand %p945_p2, %p1328_p10 }
 0x16f   : > { %p951_p3 = por %p950_p8, %p949_p6 }
 0x170   : > { %p947_p4 = pneg %p946_p1 }
 0x172   : > { %p952_p7 = pnand %p951_p3, %p947_p4 }
 0x174   : > { %955 = shalt.err (!%p952_p7)
}
 0x175   : > { %775 = dma.vmem_to_hbm [thread:$0]  (%p1328_p10), %s556_s23, 32, %s1273_s9, %s526_s7  }
 0x176 PF: > { %p796_p9 = scmp.ge.s32.totalorder %s1002_s15, 2  ;;  %s567_s28 = sand.u32 1, %s990_s12  }
 0x177   : > { %p1329_p11 = scmp.ne.s32.totalorder %s1318_s19, 0  ;;  %s568_s29 = scalar_lea.sflag [#allocation4], %s567_s28 }
 0x179   : > { %p787_p12 = pnand %p796_p9, %p1329_p11 }
 0x17b   : > { %p788_p13 = pneg %p787_p12 }
 0x17d   : > { %981 = dma.done.wait (%p788_p13), %s568_s29, 2048  }
 0x17e   : > { %983 = vsyncadd (%p788_p13), %s568_s29, 4294965248  ;;  %s577_s17 = scalar_lea.sflag [#allocation9], %s567_s28 }
 0x17f   : > { %985 = dma.done.wait (%p788_p13), %s577_s17, 32  }
 0x180   : > { %987 = vsyncadd (%p788_p13), %s577_s17, 4294967264  ;;  %p21_p10 = scmp.ge.s32.totalorder %s1085_s24, 6   ;;  %s1330_s12 = smov %s994_s13 }
 0x181   : > { %s1331_s13 = smov %s998_s14  ;;  %s1332_s14 = smov %s1105_s5 }
 0x182   : > { %s1333_s15 = smov %s1085_s24  ;;  %23 = sbr.rel (!%p21_p10) target bundleno = 8 (0x8), region = 94 }
 0x187   :  { %582 = vsyncpa [#allocation3], 1 }
 0x188   :  { %584 = vsyncpa [#allocation3 + $0x1], 1 }
 0x189   :  { %585 = vsyncpa [#allocation6], 1 }
 0x18a   :  { %586 = vsyncpa [#allocation4], 1 }
 0x18b   :  { %588 = vsyncpa [#allocation4 + $0x1], 1 }
 0x18c   :  { %589 = vsyncpa [#allocation9], 1 }
 0x18d   :  { %591 = vsyncpa [#allocation9 + $0x1], 1 }

</bundles_post_ra>
